<compile_context>
chip_gen: v5e
topology: v5e:2x2
jax: 0.10.0
libtpu: 0.0.40
codegen_flags: <defaults>
</compile_context>

<pallas_src>
from functools import partial

import jax
import jax.numpy as jnp
from jax.experimental import pallas as pl
from jax.experimental.pallas import tpu as pltpu

FEATURE_NUM = 32
TARGET_NUM = 3          # `target_num` is a free global in the reference module; pick 3
LN_EPS = 1e-5

HEAD_IN = 128 + 64 + 32 + 8       # 232
HEAD_K_PAD = 256                  # padded K for the fused head matmul
OUT_PAD = 128                     # lane-dense padded output width
ALIGN = 16                        # bf16 sublane packing -> keep batch tiles 16-aligned


def _round_up(v, m):
    return ((v + m - 1) // m) * m


def _linear_ln_relu(x_bf, w_ref, pk_ref, layer, width):
    """bf16 matmul (f32 accum) -> +bias -> LayerNorm (f32, biased var) -> ReLU -> bf16."""
    h = jnp.dot(x_bf, w_ref[...], preferred_element_type=jnp.float32)
    h = h + pk_ref[layer:layer + 1, 0:width]                      # linear bias
    mu = jnp.mean(h, axis=-1, keepdims=True)
    xc = h - mu
    var = jnp.mean(xc * xc, axis=-1, keepdims=True)
    hn = xc * jax.lax.rsqrt(var + LN_EPS)
    hn = hn * pk_ref[4 + layer:5 + layer, 0:width] \
            + pk_ref[8 + layer:9 + layer, 0:width]                # LN affine
    return jnp.maximum(hn, 0.0).astype(jnp.bfloat16)


def multimodel_kernel(x_ref, w1, w2, w3, w4, wh, pk, out_ref, cat_ref):
    # Chain of Linear -> LayerNorm -> ReLU blocks (bf16 into MXU, f32 LN math).
    x128 = _linear_ln_relu(x_ref[...], w1, pk, 0, 128)   # (tb, 128)
    x64  = _linear_ln_relu(x128,      w2, pk, 1, 64)     # (tb, 64)
    x32  = _linear_ln_relu(x64,       w3, pk, 2, 32)     # (tb, 32)
    x8   = _linear_ln_relu(x32,       w4, pk, 3, 8)      # (tb, 8)

    # Build concat([x128, x64, x32, x8]) contiguously in VMEM (zero-pad to K=256)
    # so the head is a single MXU pass instead of four tiny ones.
    cat_ref[:, 0:128]   = x128
    cat_ref[:, 128:192] = x64
    cat_ref[:, 192:224] = x32
    cat_ref[:, 224:232] = x8
    cat_ref[:, 232:256] = jnp.zeros((cat_ref.shape[0], 24), cat_ref.dtype)

    out = jnp.dot(cat_ref[...], wh[...], preferred_element_type=jnp.float32)
    out_ref[...] = out + pk[12:13, :]                    # padded head bias (lane-dense)


def _pack_kernel_params(params):
    """Pack per-feature vectors into one (13,128) f32 array; pad+cast weights to bf16."""
    T = params["bh"].shape[-1]
    widths = (128, 64, 32, 8)
    pk = jnp.zeros((13, 128), jnp.float32)
    for idx, w in enumerate(widths, start=1):
        pk = pk.at[idx - 1, :w].set(params[f"b{idx}"][0])    # rows 0..3: linear bias
        pk = pk.at[3 + idx, :w].set(params[f"g{idx}"][0])    # rows 4..7: LN gamma
        pk = pk.at[7 + idx, :w].set(params[f"be{idx}"][0])   # rows 8..11: LN beta
    pk = pk.at[12, :T].set(params["bh"][0])                  # row 12: head bias (padded)

    wh_pad = jnp.zeros((HEAD_K_PAD, OUT_PAD), jnp.float32)
    wh_pad = wh_pad.at[:HEAD_IN, :T].set(params["wh"])

    return dict(
        w1=params["w1"].astype(jnp.bfloat16),
        w2=params["w2"].astype(jnp.bfloat16),
        w3=params["w3"].astype(jnp.bfloat16),
        w4=params["w4"].astype(jnp.bfloat16),
        wh=wh_pad.astype(jnp.bfloat16),
        pk=pk,
    )


@partial(jax.jit, static_argnames=("tile_b",))
def multimodel_forward(x, params, *, tile_b=512):
    B, F = x.shape
    T = params["bh"].shape[-1]
    kp = _pack_kernel_params(params)

    # Batch tiling: big tiles (amortize ~0.35us/step), 16-aligned, grid >= 2 when the
    # batch allows so the "parallel" axis shards across v7x's two TensorCores.
    B8 = _round_up(B, ALIGN)
    tile = min(_round_up(tile_b, ALIGN), B8)
    if B8 // tile < 2 and B8 >= 2 * ALIGN:
        tile = _round_up(pl.cdiv(B8, 2), ALIGN)
    grid = pl.cdiv(B8, tile)
    B_pad = grid * tile

    x_p = x if B_pad == B else jnp.pad(x, ((0, B_pad - B), (0, 0)))
    x_bf = x_p.astype(jnp.bfloat16)

    def full_spec(shape):
        return pl.BlockSpec(shape, lambda i: (0,) * len(shape))

    in_specs = [
        pl.BlockSpec((tile, F), lambda i: (i, 0)),   # x: tiled over batch
        full_spec(kp["w1"].shape),
        full_spec(kp["w2"].shape),
        full_spec(kp["w3"].shape),
        full_spec(kp["w4"].shape),
        full_spec(kp["wh"].shape),
        full_spec(kp["pk"].shape),
    ]

    out_full = pl.pallas_call(
        multimodel_kernel,
        out_shape=jax.ShapeDtypeStruct((B_pad, OUT_PAD), jnp.float32),
        grid=(grid,),
        in_specs=in_specs,
        out_specs=pl.BlockSpec((tile, OUT_PAD), lambda i: (i, 0)),
        scratch_shapes=[pltpu.VMEM((tile, HEAD_K_PAD), jnp.bfloat16)],
        compiler_params=pltpu.CompilerParams(dimension_semantics=("parallel",)),
    )(x_bf, kp["w1"], kp["w2"], kp["w3"], kp["w4"], kp["wh"], kp["pk"])

    return out_full[:B, :T]


def init_params(key, feature_num=FEATURE_NUM, target_num=TARGET_NUM):
    dims = [(feature_num, 128), (128, 64), (64, 32), (32, 8)]
    keys = jax.random.split(key, 10)
    params = {}
    ki = 0
    for idx, (din, dout) in enumerate(dims, start=1):
        scale = 1.0 / jnp.sqrt(din)
        params[f"w{idx}"] = jax.random.uniform(
            keys[ki], (din, dout), jnp.float32, -scale, scale); ki += 1
        params[f"b{idx}"] = jax.random.uniform(
            keys[ki], (1, dout), jnp.float32, -scale, scale); ki += 1
        # LayerNorm affine params (PyTorch default init: ones / zeros)
        params[f"g{idx}"] = jnp.ones((1, dout), jnp.float32)
        params[f"be{idx}"] = jnp.zeros((1, dout), jnp.float32)
    scale = 1.0 / jnp.sqrt(HEAD_IN)
    params["wh"] = jax.random.uniform(
        keys[ki], (HEAD_IN, target_num), jnp.float32, -scale, scale); ki += 1
    params["bh"] = jax.random.uniform(
        keys[ki], (1, target_num), jnp.float32, -scale, scale)
    return params


def reference_forward(x, params):
    """Plain-JAX reference mirroring the kernel numerics (bf16 matmuls, f32 LN)."""
    def block(x, w, b, g, be):
        h = jnp.dot(x.astype(jnp.bfloat16), w.astype(jnp.bfloat16),
                    preferred_element_type=jnp.float32) + b
        mu = jnp.mean(h, axis=-1, keepdims=True)
        var = jnp.mean((h - mu) ** 2, axis=-1, keepdims=True)
        hn = (h - mu) * jax.lax.rsqrt(var + LN_EPS) * g + be
        return jnp.maximum(hn, 0.0)

    x128 = block(x, params["w1"], params["b1"], params["g1"], params["be1"])
    x64 = block(x128, params["w2"], params["b2"], params["g2"], params["be2"])
    x32 = block(x64, params["w3"], params["b3"], params["g3"], params["be3"])
    x8 = block(x32, params["w4"], params["b4"], params["g4"], params["be4"])
    cat = jnp.concatenate([x128, x64, x32, x8], axis=1)
    return jnp.dot(cat.astype(jnp.bfloat16), params["wh"].astype(jnp.bfloat16),
                   preferred_element_type=jnp.float32) + params["bh"]


if __name__ == "__main__":
    key = jax.random.PRNGKey(0)
    k_x, k_p = jax.random.split(key)
    B = 32
    x = jax.random.normal(k_x, (B, FEATURE_NUM), jnp.float32)
    params = init_params(k_p)

    out = multimodel_forward(x, params)
    out = jax.block_until_ready(out)

    ref = reference_forward(x, params)
    assert out.shape == (B, TARGET_NUM)
    assert jnp.allclose(out, ref, atol=2e-2, rtol=2e-2), "mismatch vs reference"
    print("KERNEL_OK")
</pallas_src>

<mosaic_0001>
module attributes {stable_mosaic.version = 11 : i64} {
  func.func @multimodel_kernel(%arg0: i32, %arg1: memref<16x32xbf16, #tpu.memory_space<vmem>>, %arg2: memref<32x128xbf16, #tpu.memory_space<vmem>>, %arg3: memref<128x64xbf16, #tpu.memory_space<vmem>>, %arg4: memref<64x32xbf16, #tpu.memory_space<vmem>>, %arg5: memref<32x8xbf16, #tpu.memory_space<vmem>>, %arg6: memref<256x128xbf16, #tpu.memory_space<vmem>>, %arg7: memref<13x128xf32, #tpu.memory_space<vmem>>, %arg8: memref<16x128xf32, #tpu.memory_space<vmem>>, %arg9: memref<16x256xbf16, #tpu.memory_space<vmem>>) attributes {dimension_semantics = [#tpu.dimension_semantics<parallel>], iteration_bounds = array<i64: 2>, scalar_prefetch = 0 : i64, scratch_operands = 1 : i64, tpu.core_type = #tpu.core_type<tc>, window_params = [{transform_indices = @transform_0, window_bounds = array<i64: 16, 32>}, {pipeline_mode = #tpu.pipeline_mode<synchronous>, transform_indices = @transform_1, window_bounds = array<i64: 32, 128>}, {pipeline_mode = #tpu.pipeline_mode<synchronous>, transform_indices = @transform_2, window_bounds = array<i64: 128, 64>}, {pipeline_mode = #tpu.pipeline_mode<synchronous>, transform_indices = @transform_3, window_bounds = array<i64: 64, 32>}, {pipeline_mode = #tpu.pipeline_mode<synchronous>, transform_indices = @transform_4, window_bounds = array<i64: 32, 8>}, {pipeline_mode = #tpu.pipeline_mode<synchronous>, transform_indices = @transform_5, window_bounds = array<i64: 256, 128>}, {pipeline_mode = #tpu.pipeline_mode<synchronous>, transform_indices = @transform_6, window_bounds = array<i64: 13, 128>}, {transform_indices = @transform_7, window_bounds = array<i64: 16, 128>}]} {
    %c0 = arith.constant 0 : index
    %c0_0 = arith.constant 0 : index
    %0 = vector.load %arg1[%c0, %c0_0] : memref<16x32xbf16, #tpu.memory_space<vmem>>, vector<16x32xbf16>
    %c0_1 = arith.constant 0 : index
    %c0_2 = arith.constant 0 : index
    %1 = vector.load %arg2[%c0_1, %c0_2] : memref<32x128xbf16, #tpu.memory_space<vmem>>, vector<32x128xbf16>
    %cst = arith.constant dense<0.000000e+00> : vector<16x128xf32>
    %2 = tpu.matmul %0, %1, %cst {dimension_numbers = #tpu.dot_dimension_numbers<[1], [0], [0], [1], [0, 0, 1, 1], [], []>} : vector<16x32xbf16>, vector<32x128xbf16>, vector<16x128xf32> -> vector<16x128xf32>
    %c0_3 = arith.constant 0 : index
    %c0_4 = arith.constant 0 : index
    %3 = vector.load %arg7[%c0_3, %c0_4] : memref<13x128xf32, #tpu.memory_space<vmem>>, vector<1x128xf32>
    %4 = vector.broadcast %3 : vector<1x128xf32> to vector<16x128xf32>
    %5 = arith.addf %2, %4 : vector<16x128xf32>
    %cst_5 = arith.constant dense<0.000000e+00> : vector<16xf32>
    %6 = vector.multi_reduction <add>, %5, %cst_5 [1] : vector<16x128xf32> to vector<16xf32>
    %7 = vector.shape_cast %6 : vector<16xf32> to vector<16x1xf32>
    %cst_6 = arith.constant 1.280000e+02 : f32
    %8 = vector.broadcast %cst_6 : f32 to vector<16x1xf32>
    %9 = arith.divf %7, %8 : vector<16x1xf32>
    %10 = vector.broadcast %9 : vector<16x1xf32> to vector<16x128xf32>
    %11 = arith.subf %5, %10 : vector<16x128xf32>
    %12 = arith.mulf %11, %11 : vector<16x128xf32>
    %cst_7 = arith.constant dense<0.000000e+00> : vector<16xf32>
    %13 = vector.multi_reduction <add>, %12, %cst_7 [1] : vector<16x128xf32> to vector<16xf32>
    %14 = vector.shape_cast %13 : vector<16xf32> to vector<16x1xf32>
    %cst_8 = arith.constant 1.280000e+02 : f32
    %15 = vector.broadcast %cst_8 : f32 to vector<16x1xf32>
    %16 = arith.divf %14, %15 : vector<16x1xf32>
    %cst_9 = arith.constant 9.99999974E-6 : f32
    %17 = vector.broadcast %cst_9 : f32 to vector<16x1xf32>
    %18 = arith.addf %16, %17 : vector<16x1xf32>
    %19 = math.rsqrt %18 : vector<16x1xf32>
    %20 = vector.broadcast %19 : vector<16x1xf32> to vector<16x128xf32>
    %21 = arith.mulf %11, %20 : vector<16x128xf32>
    %c4 = arith.constant 4 : index
    %c0_10 = arith.constant 0 : index
    %22 = vector.load %arg7[%c4, %c0_10] : memref<13x128xf32, #tpu.memory_space<vmem>>, vector<1x128xf32>
    %23 = vector.broadcast %22 : vector<1x128xf32> to vector<16x128xf32>
    %24 = arith.mulf %21, %23 : vector<16x128xf32>
    %c8 = arith.constant 8 : index
    %c0_11 = arith.constant 0 : index
    %25 = vector.load %arg7[%c8, %c0_11] : memref<13x128xf32, #tpu.memory_space<vmem>>, vector<1x128xf32>
    %26 = vector.broadcast %25 : vector<1x128xf32> to vector<16x128xf32>
    %27 = arith.addf %24, %26 : vector<16x128xf32>
    %cst_12 = arith.constant 0.000000e+00 : f32
    %28 = vector.broadcast %cst_12 : f32 to vector<16x128xf32>
    %29 = arith.maximumf %27, %28 : vector<16x128xf32>
    %30 = arith.truncf %29 : vector<16x128xf32> to vector<16x128xbf16>
    %c0_13 = arith.constant 0 : index
    %c0_14 = arith.constant 0 : index
    %31 = vector.load %arg3[%c0_13, %c0_14] : memref<128x64xbf16, #tpu.memory_space<vmem>>, vector<128x64xbf16>
    %cst_15 = arith.constant dense<0.000000e+00> : vector<16x64xf32>
    %32 = tpu.matmul %30, %31, %cst_15 {dimension_numbers = #tpu.dot_dimension_numbers<[1], [0], [0], [1], [0, 0, 1, 1], [], []>} : vector<16x128xbf16>, vector<128x64xbf16>, vector<16x64xf32> -> vector<16x64xf32>
    %c1 = arith.constant 1 : index
    %c0_16 = arith.constant 0 : index
    %33 = vector.load %arg7[%c1, %c0_16] : memref<13x128xf32, #tpu.memory_space<vmem>>, vector<1x64xf32>
    %34 = vector.broadcast %33 : vector<1x64xf32> to vector<16x64xf32>
    %35 = arith.addf %32, %34 : vector<16x64xf32>
    %cst_17 = arith.constant dense<0.000000e+00> : vector<16xf32>
    %36 = vector.multi_reduction <add>, %35, %cst_17 [1] : vector<16x64xf32> to vector<16xf32>
    %37 = vector.shape_cast %36 : vector<16xf32> to vector<16x1xf32>
    %cst_18 = arith.constant 6.400000e+01 : f32
    %38 = vector.broadcast %cst_18 : f32 to vector<16x1xf32>
    %39 = arith.divf %37, %38 : vector<16x1xf32>
    %40 = vector.broadcast %39 : vector<16x1xf32> to vector<16x64xf32>
    %41 = arith.subf %35, %40 : vector<16x64xf32>
    %42 = arith.mulf %41, %41 : vector<16x64xf32>
    %cst_19 = arith.constant dense<0.000000e+00> : vector<16xf32>
    %43 = vector.multi_reduction <add>, %42, %cst_19 [1] : vector<16x64xf32> to vector<16xf32>
    %44 = vector.shape_cast %43 : vector<16xf32> to vector<16x1xf32>
    %cst_20 = arith.constant 6.400000e+01 : f32
    %45 = vector.broadcast %cst_20 : f32 to vector<16x1xf32>
    %46 = arith.divf %44, %45 : vector<16x1xf32>
    %cst_21 = arith.constant 9.99999974E-6 : f32
    %47 = vector.broadcast %cst_21 : f32 to vector<16x1xf32>
    %48 = arith.addf %46, %47 : vector<16x1xf32>
    %49 = math.rsqrt %48 : vector<16x1xf32>
    %50 = vector.broadcast %49 : vector<16x1xf32> to vector<16x64xf32>
    %51 = arith.mulf %41, %50 : vector<16x64xf32>
    %c5 = arith.constant 5 : index
    %c0_22 = arith.constant 0 : index
    %52 = vector.load %arg7[%c5, %c0_22] : memref<13x128xf32, #tpu.memory_space<vmem>>, vector<1x64xf32>
    %53 = vector.broadcast %52 : vector<1x64xf32> to vector<16x64xf32>
    %54 = arith.mulf %51, %53 : vector<16x64xf32>
    %c9 = arith.constant 9 : index
    %c0_23 = arith.constant 0 : index
    %55 = vector.load %arg7[%c9, %c0_23] : memref<13x128xf32, #tpu.memory_space<vmem>>, vector<1x64xf32>
    %56 = vector.broadcast %55 : vector<1x64xf32> to vector<16x64xf32>
    %57 = arith.addf %54, %56 : vector<16x64xf32>
    %cst_24 = arith.constant 0.000000e+00 : f32
    %58 = vector.broadcast %cst_24 : f32 to vector<16x64xf32>
    %59 = arith.maximumf %57, %58 : vector<16x64xf32>
    %60 = arith.truncf %59 : vector<16x64xf32> to vector<16x64xbf16>
    %c0_25 = arith.constant 0 : index
    %c0_26 = arith.constant 0 : index
    %61 = vector.load %arg4[%c0_25, %c0_26] : memref<64x32xbf16, #tpu.memory_space<vmem>>, vector<64x32xbf16>
    %cst_27 = arith.constant dense<0.000000e+00> : vector<16x32xf32>
    %62 = tpu.matmul %60, %61, %cst_27 {dimension_numbers = #tpu.dot_dimension_numbers<[1], [0], [0], [1], [0, 0, 1, 1], [], []>} : vector<16x64xbf16>, vector<64x32xbf16>, vector<16x32xf32> -> vector<16x32xf32>
    %c2 = arith.constant 2 : index
    %c0_28 = arith.constant 0 : index
    %63 = vector.load %arg7[%c2, %c0_28] : memref<13x128xf32, #tpu.memory_space<vmem>>, vector<1x32xf32>
    %64 = vector.broadcast %63 : vector<1x32xf32> to vector<16x32xf32>
    %65 = arith.addf %62, %64 : vector<16x32xf32>
    %cst_29 = arith.constant dense<0.000000e+00> : vector<16xf32>
    %66 = vector.multi_reduction <add>, %65, %cst_29 [1] : vector<16x32xf32> to vector<16xf32>
    %67 = vector.shape_cast %66 : vector<16xf32> to vector<16x1xf32>
    %cst_30 = arith.constant 3.200000e+01 : f32
    %68 = vector.broadcast %cst_30 : f32 to vector<16x1xf32>
    %69 = arith.divf %67, %68 : vector<16x1xf32>
    %70 = vector.broadcast %69 : vector<16x1xf32> to vector<16x32xf32>
    %71 = arith.subf %65, %70 : vector<16x32xf32>
    %72 = arith.mulf %71, %71 : vector<16x32xf32>
    %cst_31 = arith.constant dense<0.000000e+00> : vector<16xf32>
    %73 = vector.multi_reduction <add>, %72, %cst_31 [1] : vector<16x32xf32> to vector<16xf32>
    %74 = vector.shape_cast %73 : vector<16xf32> to vector<16x1xf32>
    %cst_32 = arith.constant 3.200000e+01 : f32
    %75 = vector.broadcast %cst_32 : f32 to vector<16x1xf32>
    %76 = arith.divf %74, %75 : vector<16x1xf32>
    %cst_33 = arith.constant 9.99999974E-6 : f32
    %77 = vector.broadcast %cst_33 : f32 to vector<16x1xf32>
    %78 = arith.addf %76, %77 : vector<16x1xf32>
    %79 = math.rsqrt %78 : vector<16x1xf32>
    %80 = vector.broadcast %79 : vector<16x1xf32> to vector<16x32xf32>
    %81 = arith.mulf %71, %80 : vector<16x32xf32>
    %c6 = arith.constant 6 : index
    %c0_34 = arith.constant 0 : index
    %82 = vector.load %arg7[%c6, %c0_34] : memref<13x128xf32, #tpu.memory_space<vmem>>, vector<1x32xf32>
    %83 = vector.broadcast %82 : vector<1x32xf32> to vector<16x32xf32>
    %84 = arith.mulf %81, %83 : vector<16x32xf32>
    %c10 = arith.constant 10 : index
    %c0_35 = arith.constant 0 : index
    %85 = vector.load %arg7[%c10, %c0_35] : memref<13x128xf32, #tpu.memory_space<vmem>>, vector<1x32xf32>
    %86 = vector.broadcast %85 : vector<1x32xf32> to vector<16x32xf32>
    %87 = arith.addf %84, %86 : vector<16x32xf32>
    %cst_36 = arith.constant 0.000000e+00 : f32
    %88 = vector.broadcast %cst_36 : f32 to vector<16x32xf32>
    %89 = arith.maximumf %87, %88 : vector<16x32xf32>
    %90 = arith.truncf %89 : vector<16x32xf32> to vector<16x32xbf16>
    %c0_37 = arith.constant 0 : index
    %c0_38 = arith.constant 0 : index
    %91 = vector.load %arg5[%c0_37, %c0_38] : memref<32x8xbf16, #tpu.memory_space<vmem>>, vector<32x8xbf16>
    %cst_39 = arith.constant dense<0.000000e+00> : vector<16x8xf32>
    %92 = tpu.matmul %90, %91, %cst_39 {dimension_numbers = #tpu.dot_dimension_numbers<[1], [0], [0], [1], [0, 0, 1, 1], [], []>} : vector<16x32xbf16>, vector<32x8xbf16>, vector<16x8xf32> -> vector<16x8xf32>
    %c3 = arith.constant 3 : index
    %c0_40 = arith.constant 0 : index
    %93 = vector.load %arg7[%c3, %c0_40] : memref<13x128xf32, #tpu.memory_space<vmem>>, vector<1x8xf32>
    %94 = vector.broadcast %93 : vector<1x8xf32> to vector<16x8xf32>
    %95 = arith.addf %92, %94 : vector<16x8xf32>
    %cst_41 = arith.constant dense<0.000000e+00> : vector<16xf32>
    %96 = vector.multi_reduction <add>, %95, %cst_41 [1] : vector<16x8xf32> to vector<16xf32>
    %97 = vector.shape_cast %96 : vector<16xf32> to vector<16x1xf32>
    %cst_42 = arith.constant 8.000000e+00 : f32
    %98 = vector.broadcast %cst_42 : f32 to vector<16x1xf32>
    %99 = arith.divf %97, %98 : vector<16x1xf32>
    %100 = vector.broadcast %99 : vector<16x1xf32> to vector<16x8xf32>
    %101 = arith.subf %95, %100 : vector<16x8xf32>
    %102 = arith.mulf %101, %101 : vector<16x8xf32>
    %cst_43 = arith.constant dense<0.000000e+00> : vector<16xf32>
    %103 = vector.multi_reduction <add>, %102, %cst_43 [1] : vector<16x8xf32> to vector<16xf32>
    %104 = vector.shape_cast %103 : vector<16xf32> to vector<16x1xf32>
    %cst_44 = arith.constant 8.000000e+00 : f32
    %105 = vector.broadcast %cst_44 : f32 to vector<16x1xf32>
    %106 = arith.divf %104, %105 : vector<16x1xf32>
    %cst_45 = arith.constant 9.99999974E-6 : f32
    %107 = vector.broadcast %cst_45 : f32 to vector<16x1xf32>
    %108 = arith.addf %106, %107 : vector<16x1xf32>
    %109 = math.rsqrt %108 : vector<16x1xf32>
    %110 = vector.broadcast %109 : vector<16x1xf32> to vector<16x8xf32>
    %111 = arith.mulf %101, %110 : vector<16x8xf32>
    %c7 = arith.constant 7 : index
    %c0_46 = arith.constant 0 : index
    %112 = vector.load %arg7[%c7, %c0_46] : memref<13x128xf32, #tpu.memory_space<vmem>>, vector<1x8xf32>
    %113 = vector.broadcast %112 : vector<1x8xf32> to vector<16x8xf32>
    %114 = arith.mulf %111, %113 : vector<16x8xf32>
    %c11 = arith.constant 11 : index
    %c0_47 = arith.constant 0 : index
    %115 = vector.load %arg7[%c11, %c0_47] : memref<13x128xf32, #tpu.memory_space<vmem>>, vector<1x8xf32>
    %116 = vector.broadcast %115 : vector<1x8xf32> to vector<16x8xf32>
    %117 = arith.addf %114, %116 : vector<16x8xf32>
    %cst_48 = arith.constant 0.000000e+00 : f32
    %118 = vector.broadcast %cst_48 : f32 to vector<16x8xf32>
    %119 = arith.maximumf %117, %118 : vector<16x8xf32>
    %120 = arith.truncf %119 : vector<16x8xf32> to vector<16x8xbf16>
    %c0_49 = arith.constant 0 : index
    %c0_50 = arith.constant 0 : index
    %121 = vector.load %arg9[%c0_49, %c0_50] : memref<16x256xbf16, #tpu.memory_space<vmem>>, vector<16x128xbf16>
    tpu.vector_store %arg9[%c0_49, %c0_50], %30 {strides = array<i32>} : memref<16x256xbf16, #tpu.memory_space<vmem>>, vector<16x128xbf16>,
    %c0_51 = arith.constant 0 : index
    %c128 = arith.constant 128 : index
    %122 = vector.load %arg9[%c0_51, %c128] : memref<16x256xbf16, #tpu.memory_space<vmem>>, vector<16x64xbf16>
    tpu.vector_store %arg9[%c0_51, %c128], %60 {strides = array<i32>} : memref<16x256xbf16, #tpu.memory_space<vmem>>, vector<16x64xbf16>,
    %c0_52 = arith.constant 0 : index
    %c192 = arith.constant 192 : index
    %123 = vector.load %arg9[%c0_52, %c192] : memref<16x256xbf16, #tpu.memory_space<vmem>>, vector<16x32xbf16>
    tpu.vector_store %arg9[%c0_52, %c192], %90 {strides = array<i32>} : memref<16x256xbf16, #tpu.memory_space<vmem>>, vector<16x32xbf16>,
    %c0_53 = arith.constant 0 : index
    %c224 = arith.constant 224 : index
    %124 = vector.load %arg9[%c0_53, %c224] : memref<16x256xbf16, #tpu.memory_space<vmem>>, vector<16x8xbf16>
    tpu.vector_store %arg9[%c0_53, %c224], %120 {strides = array<i32>} : memref<16x256xbf16, #tpu.memory_space<vmem>>, vector<16x8xbf16>,
    %cst_54 = arith.constant 0.000000e+00 : bf16
    %125 = vector.broadcast %cst_54 : bf16 to vector<16x24xbf16>
    %c0_55 = arith.constant 0 : index
    %c232 = arith.constant 232 : index
    %126 = vector.load %arg9[%c0_55, %c232] : memref<16x256xbf16, #tpu.memory_space<vmem>>, vector<16x24xbf16>
    tpu.vector_store %arg9[%c0_55, %c232], %125 {strides = array<i32>} : memref<16x256xbf16, #tpu.memory_space<vmem>>, vector<16x24xbf16>,
    %c0_56 = arith.constant 0 : index
    %c0_57 = arith.constant 0 : index
    %127 = vector.load %arg9[%c0_56, %c0_57] : memref<16x256xbf16, #tpu.memory_space<vmem>>, vector<16x256xbf16>
    %c0_58 = arith.constant 0 : index
    %c0_59 = arith.constant 0 : index
    %128 = vector.load %arg6[%c0_58, %c0_59] : memref<256x128xbf16, #tpu.memory_space<vmem>>, vector<256x128xbf16>
    %cst_60 = arith.constant dense<0.000000e+00> : vector<16x128xf32>
    %129 = tpu.matmul %127, %128, %cst_60 {dimension_numbers = #tpu.dot_dimension_numbers<[1], [0], [0], [1], [0, 0, 1, 1], [], []>} : vector<16x256xbf16>, vector<256x128xbf16>, vector<16x128xf32> -> vector<16x128xf32>
    %c12 = arith.constant 12 : index
    %c0_61 = arith.constant 0 : index
    %130 = vector.load %arg7[%c12, %c0_61] : memref<13x128xf32, #tpu.memory_space<vmem>>, vector<1x128xf32>
    %131 = vector.broadcast %130 : vector<1x128xf32> to vector<16x128xf32>
    %132 = arith.addf %129, %131 : vector<16x128xf32>
    %c0_62 = arith.constant 0 : index
    %c0_63 = arith.constant 0 : index
    %133 = vector.load %arg8[%c0_62, %c0_63] : memref<16x128xf32, #tpu.memory_space<vmem>>, vector<16x128xf32>
    tpu.vector_store %arg8[%c0_62, %c0_63], %132 {strides = array<i32>} : memref<16x128xf32, #tpu.memory_space<vmem>>, vector<16x128xf32>,
    return
  }
  func.func @transform_0(%arg0: i32) -> (i32, i32) {
    %c0_i32 = arith.constant 0 : i32
    %c0_i32_0 = arith.constant 0 : i32
    return %arg0, %c0_i32 : i32, i32
  }
  func.func @transform_1(%arg0: i32) -> (i32, i32) {
    %c0_i32 = arith.constant 0 : i32
    %c0_i32_0 = arith.constant 0 : i32
    %c0_i32_1 = arith.constant 0 : i32
    return %c0_i32, %c0_i32_0 : i32, i32
  }
  func.func @transform_2(%arg0: i32) -> (i32, i32) {
    %c0_i32 = arith.constant 0 : i32
    %c0_i32_0 = arith.constant 0 : i32
    %c0_i32_1 = arith.constant 0 : i32
    return %c0_i32, %c0_i32_0 : i32, i32
  }
  func.func @transform_3(%arg0: i32) -> (i32, i32) {
    %c0_i32 = arith.constant 0 : i32
    %c0_i32_0 = arith.constant 0 : i32
    %c0_i32_1 = arith.constant 0 : i32
    return %c0_i32, %c0_i32_0 : i32, i32
  }
  func.func @transform_4(%arg0: i32) -> (i32, i32) {
    %c0_i32 = arith.constant 0 : i32
    %c0_i32_0 = arith.constant 0 : i32
    %c0_i32_1 = arith.constant 0 : i32
    return %c0_i32, %c0_i32_0 : i32, i32
  }
  func.func @transform_5(%arg0: i32) -> (i32, i32) {
    %c0_i32 = arith.constant 0 : i32
    %c0_i32_0 = arith.constant 0 : i32
    %c0_i32_1 = arith.constant 0 : i32
    return %c0_i32, %c0_i32_0 : i32, i32
  }
  func.func @transform_6(%arg0: i32) -> (i32, i32) {
    %c0_i32 = arith.constant 0 : i32
    %c0_i32_0 = arith.constant 0 : i32
    %c0_i32_1 = arith.constant 0 : i32
    return %c0_i32, %c0_i32_0 : i32, i32
  }
  func.func @transform_7(%arg0: i32) -> (i32, i32) {
    %c0_i32 = arith.constant 0 : i32
    %c0_i32_0 = arith.constant 0 : i32
    return %arg0, %c0_i32 : i32, i32
  }
}

</mosaic_0001>

<bundles_post_ra>
// kernel: multimodel_forward.1
= control target key start
LH: loop header
LB: loop body
LE: loop exit
PB: predicated region body
PF: predicated region fallthrough
CT: control target
= control target key end

     0   :  { %s1310_s24 = smov 0   ;;  %s1486_s0 = inlined_call_operand.vmem [shape: bf16[32,32], index: 0, kind: input, shape index: {}]   ;;  %s1487_s1 = inlined_call_operand.vmem [shape: bf16[32,128], index: 1, kind: input, shape index: {}]   ;;  %s1488_s2 = inlined_call_operand.vmem [shape: bf16[128,64], index: 2, kind: input, shape index: {}]   ;;  %s1489_s3 = inlined_call_operand.vmem [shape: bf16[64,32], index: 3, kind: input, shape index: {}]   ;;  %s1490_s4 = inlined_call_operand.vmem [shape: bf16[32,8], index: 4, kind: input, shape index: {}]   ;;  %s1491_s5 = inlined_call_operand.vmem [shape: bf16[256,128], index: 5, kind: input, shape index: {}]   ;;  %s1492_s6 = inlined_call_operand.vmem [shape: f32[13,128], index: 6, kind: input, shape index: {}]   ;;  %s1493_s7 = inlined_call_operand.vmem [shape: f32[32,128], index: 7, kind: output, shape index: {}]  }
   0x1 LB: > { %s1014_s25 = sadd.s32 4294967295, %s1261_s24   ;;  %p1018_p0 = scmp.ge.s32.totalorder %s1261_s24, 1  ;;  %s1261_s24 = sphi %s1310_s24, %s17_s24  }
   0x2   : > { %p238_p1 = scmp.lt.s32.totalorder %s1261_s24, 3 }
   0x4   : > { %p239_p2 = pnand %p1018_p0, %p238_p1 }
   0x5   : > { %s1019_s28 = sshll.u32 (!%p239_p2), %s1014_s25, 1  ;;  %s1266_s13 = smov (!%p239_p2), 64  }
   0x6   : > { %242 = sbr.rel (%p239_p2) target bundleno = 1940 (0x794), region = 48  ;;  %p271_p3 = scmp.lt.s32.totalorder (!%p239_p2), %s1019_s28, 3 }
   0x7   : > { %s1268_s20 = smov (!%p239_p2), 96  }
   0xb   : > { %v1170_v0 = vld [vmem:[%s1487_s1 + $0x8] sm:$0xff]  ;;  %v1169_v1 = vld [vmem:[%s1487_s1] sm:$0xff]  ;;  %s1495_s28 = smov (!%p271_p3, %s1019_s28), 3  ;;  %vm308_vm0 = vcmask 261120   ;;  %v1263_v8 = vmov 128.0   ;;  %v1178_v23 = vld [vmem:[%s1488_s2 + $0x38] sm:$0xff] }
   0xc   : > { %318 = vmatpush.bf16.msra.mxu2 %v1170_v0  ;;  %s1020_s8 = sshll.u32 %s1495_s28, 2  ;;  %v1218_v3 = vld [vmem:[%s1492_s6] ss:$0 sm:$0xff]  ;;  %1231 = vrcp.f32 %v1263_v8  ;;  %457 = vmatpush.bf16.msra.mxu1 %v1178_v23  ;;  %v1177_v24 = vld [vmem:[%s1488_s2 + $0x30] sm:$0xff]  ;;  %v1194_v25 = vld [vmem:[%s1491_s5 + $0x38] sm:$0xff]  ;;  %vm471_vm8 = vcmask 523264  }
   0xd   : > { %s274_s11 = scalar_lea.vmem %s1486_s0, %s1020_s8  ;;  %928 = vmatpush.bf16.msra.mxu0 %v1194_v25  ;;  %v1176_v26 = vld [vmem:[%s1488_s2 + $0x28] sm:$0xff]  ;;  %v1193_v27 = vld [vmem:[%s1491_s5 + $0x30] sm:$0xff]  ;;  %v1175_v28 = vld [vmem:[%s1488_s2 + $0x20] sm:$0xff]  ;;  %s1022_s16 = sshll.u32 %s1495_s28, 3 }
   0xe   : > { %v1168_v2 = vld [vmem:[%s274_s11] sm:$0xff]  ;;  %v1192_v29 = vld [vmem:[%s1491_s5 + $0x28] sm:$0xff]  ;;  %v1174_v30 = vld [vmem:[%s1488_s2 + $0x18] sm:$0xff]  ;;  %s280_s19 = scalar_lea.vmem %s1493_s7, %s1022_s16 }
   0xf   : > { %v1191_v31 = vld [vmem:[%s1491_s5 + $0x20] sm:$0xff]  ;;  %v1173_v32 = vld [vmem:[%s1488_s2 + $0x10] sm:$0xff]  ;;  %v1190_v34 = vld [vmem:[%s1491_s5 + $0x18] sm:$0xff] }
  0x10   : > { %319 = vmatpush.bf16.msra.mxu2 %v1169_v1  ;;  %458 = vmatpush.bf16.msra.mxu1 %v1177_v24  ;;  %v1172_v36 = vld [vmem:[%s1488_s2 + $0x8] sm:$0xff]  ;;  %v1189_v38 = vld [vmem:[%s1491_s5 + $0x10] sm:$0xff]  ;;  %v1171_v39 = vld [vmem:[%s1488_s2] sm:$0xff] }
  0x11   : > { %929 = vmatpush.bf16.msra.mxu0 %v1193_v27  ;;  %v1188_v41 = vld [vmem:[%s1491_s5 + $0x8] sm:$0xff]  ;;  %v1187_v46 = vld [vmem:[%s1491_s5] sm:$0xff] }
  0x12   : > { %v1232_v9 = vpop.eup %1231  ;;  %v1219_v53 = vld [vmem:[%s1492_s6 + $0x4] ss:$0 sm:$0xff]  ;;  %v1220_v57 = vld [vmem:[%s1492_s6 + $0x8] ss:$0 sm:$0xff] }
  0x13   : > { %1035 = vmatmul.msk.bf16.vlgmr.msra.gmra.mxu2 %vm308_vm0, %v1168_v2  ;;  %v331_v10 = vmul.f32 128.0, %v1232_v9  ;;  %vm335_vm1 = vweird.f32 %v1232_v9 }
  0x14   : > { %459 = vmatpush.bf16.msra.mxu1 %v1176_v26 }
  0x15   : > { %v332_v11 = vsub.f32 1.0, %v331_v10  ;;  %930 = vmatpush.bf16.msra.mxu0 %v1192_v29 }
  0x17   : > { %v333_v12 = vmul.f32 %v1232_v9, %v332_v11 }
  0x18   : > { %460 = vmatpush.bf16.msra.mxu1 %v1175_v28 }
  0x19   : > { %v334_v13 = vadd.f32 %v1232_v9, %v333_v12  ;;  %931 = vmatpush.bf16.msra.mxu0 %v1191_v31 }
  0x1b   : > { %v336_v14 = vsel %vm335_vm1, %v1232_v9, %v334_v13  ;;  %v1221_v13 = vld [vmem:[%s1492_s6 + $0x1] ss:$0 sm:$0xff]  ;;  %vm760_vm1 = vcmask 519168  }
  0x1c   : > { %461 = vmatpush.bf16.msra.mxu1 %v1174_v30 }
  0x1d   : > { %932 = vmatpush.bf16.msra.mxu0 %v1190_v34 }
  0x20   : > { %462 = vmatpush.bf16.msra.mxu1 %v1173_v32 }
  0x21   : > { %933 = vmatpush.bf16.msra.mxu0 %v1189_v38 }
  0x24   : > { %463 = vmatpush.bf16.msra.mxu1 %v1172_v36 }
  0x25   : > { %934 = vmatpush.bf16.msra.mxu0 %v1188_v41  ;;  %v1180_v41 = vld [vmem:[%s1489_s3 + $0x8] sm:$0xff] }
  0x28   : > { %464 = vmatpush.bf16.msra.mxu1 %v1171_v39  ;;  %v1181_v39 = vld [vmem:[%s1489_s3 + $0x10] sm:$0xff] }
  0x29   : > { %935 = vmatpush.bf16.msra.mxu0 %v1187_v46 }
  0x96   : > { %v321_v4 = vpop.f32.mrf.mxu2 }
  0x97   : > { %v322_v5 = vadd.f32 %v1218_v3, %v321_v4 }
  0x99   : > { %326 = vadd.xlane.f32.xlu0 %v322_v5 }
  0x9e   : > { %v323_v6 = vpop.f32.mrf.mxu2 }
  0x9f   : > { %v324_v7 = vadd.f32 %v1218_v3, %v323_v6 }
  0xa1   : > { %328 = vadd.xlane.f32.xlu0 %v324_v7 }
 0x10c   : > { %v327_v15 = vpop.xlane.xlu0 %326 }
 0x10d   : > { %v337_v16 = vmul.f32 %v336_v14, %v327_v15 }
 0x10f   : > { %v339_v17 = vsub.f32 %v322_v5, %v337_v16 }
 0x111   : > { %v341_v18 = vmul.f32 %v339_v17, %v339_v17 }
 0x113   : > { %343 = vadd.xlane.f32.xlu1 %v341_v18 }
 0x114   : > { %v329_v19 = vpop.xlane.xlu0 %328 }
 0x115   : > { %v338_v20 = vmul.f32 %v336_v14, %v329_v19 }
 0x117   : > { %v1334_v21 = vsub.f32 %v324_v7, %v338_v20  ;;  %v1264_v20 = vmov 64.0  }
 0x119   : > { %v342_v22 = vmul.f32 %v1334_v21, %v1334_v21 }
 0x11b   : > { %345 = vadd.xlane.f32.xlu1 %v342_v22 }
 0x186   : > { %v344_v33 = vpop.xlane.xlu1 %343 }
 0x187   : > { %v347_v35 = vmul.f32 %v344_v33, %v336_v14 }
 0x189   : > { %v349_v37 = vadd.f32 1e-05, %v347_v35 }
 0x18b   : > { %1233 = vrsqrt.f32 %v349_v37  ;;  %vm357_vm3 = vweird.f32 %v349_v37 }
 0x18e   : > { %v346_v40 = vpop.xlane.xlu1 %345 }
 0x18f   : > { %v348_v42 = vmul.f32 %v346_v40, %v336_v14 }
 0x191   : > { %v1234_v43 = vpop.eup %1233  ;;  %v350_v44 = vadd.f32 1e-05, %v348_v42 }
 0x192   : > { %v352_v45 = vmul.f32 %v1234_v43, %v349_v37  ;;  %vm358_vm2 = vweird.f32 %v1234_v43  ;;  %v1182_v37 = vld [vmem:[%s1489_s3 + $0x18] sm:$0xff] }
 0x193   : > { %1235 = vrsqrt.f32 %v350_v44  ;;  %vm359_vm4 = vmor %vm357_vm3, %vm358_vm2  ;;  %vm367_vm6 = vweird.f32 %v350_v44  ;;  %581 = vmatpush.bf16.msrb.mxu2 %v1182_v37 }
 0x194   : > { %v353_v47 = vmul.f32 %v1234_v43, %v352_v45  ;;  %1237 = vrcp.f32 %v1264_v20 }
 0x196   : > { %v354_v48 = vmul.f32 0.5, %v353_v47 }
 0x197   : > { %582 = vmatpush.bf16.msrb.mxu2 %v1181_v39  ;;  %v1183_v39 = vld [vmem:[%s1490_s4] sm:$0xff] }
 0x198   : > { %v355_v49 = vsub.f32 1.5, %v354_v48 }
 0x199   : > { %v1236_v50 = vpop.eup %1235 }
 0x19a   : > { %v356_v51 = vmul.f32 %v1234_v43, %v355_v49  ;;  %v362_v52 = vmul.f32 %v1236_v50, %v350_v44  ;;  %vm368_vm5 = vweird.f32 %v1236_v50 }
 0x19b   : > { %vm369_vm7 = vmor %vm367_vm6, %vm368_vm5  ;;  %583 = vmatpush.bf16.msrb.mxu2 %v1180_v41 }
 0x19c   : > { %v360_v54 = vsel %vm359_vm4, %v1234_v43, %v356_v51  ;;  %v363_v55 = vmul.f32 %v1236_v50, %v362_v52  ;;  %v1179_v43 = vld [vmem:[%s1489_s3] sm:$0xff] }
 0x19d   : > { %v371_v56 = vmul.f32 %v360_v54, %v339_v17 }
 0x19e   : > { %v364_v58 = vmul.f32 0.5, %v363_v55  ;;  %v1223_v55 = vld [vmem:[%s1492_s6 + $0x5] ss:$0 sm:$0xff] }
 0x19f   : > { %v375_v59 = vmul.f32 %v1219_v53, %v371_v56  ;;  %584 = vmatpush.bf16.msrb.mxu2 %v1179_v43 }
 0x1a0   : > { %v365_v60 = vsub.f32 1.5, %v364_v58 }
 0x1a1   : > { %v379_v61 = vadd.f32 %v1220_v57, %v375_v59  ;;  %v1224_v59 = vld [vmem:[%s1492_s6 + $0x9] ss:$0 sm:$0xff] }
 0x1a2   : > { %v366_v62 = vmul.f32 %v1236_v50, %v365_v60 }
 0x1a3   : > { %v381_v63 = vmax.f32 %v379_v61, 0.0 }
 0x1a4   : > { %v370_v0 = vsel %vm369_vm7, %v1236_v50, %v366_v62 }
 0x1a5   : > { %v372_v1 = vmul.f32 %v370_v0, %v1334_v21  ;;  %v383_v2 = vpack.c.bf16 %v381_v63, %v381_v63  ;;  %v1238_v21 = vpop.eup %1237 }
 0x1a6   : > { %v479_v22 = vmul.f32 64.0, %v1238_v21  ;;  %vm483_vm9 = vweird.f32 %v1238_v21 }
 0x1a7   : > { %v376_v3 = vmul.f32 %v1219_v53, %v372_v1  ;;  %758 = vst [vmem:[#allocation2] sm:$0xf] %v383_v2  ;;  %v405_v7 = vunpack.c.l.b16 %v383_v2 }
 0x1a8   : > { %v480_v23 = vsub.f32 1.0, %v479_v22 }
 0x1a9   : > { %v380_v4 = vadd.f32 %v1220_v57, %v376_v3 }
 0x1aa   : > { %v481_v24 = vmul.f32 %v1238_v21, %v480_v23 }
 0x1ab   : > { %v382_v5 = vmax.f32 %v380_v4, 0.0 }
 0x1ac   : > { %v482_v25 = vadd.f32 %v1238_v21, %v481_v24 }
 0x1ad   : > { %v384_v6 = vpack.c.bf16 %v382_v5, %v382_v5 }
 0x1ae   : > { %v1096_v10 = vld [vmem:[#allocation2] sm:$0xf]  ;;  %v484_v26 = vsel %vm483_vm9, %v1238_v21, %v482_v25  ;;  %vm694_vm9 = vcmask 64512  }
 0x1af   : > { %v406_v8 = vunpack.c.l.b16 %v384_v6  ;;  %759 = vst [vmem:[#allocation2 + $0x8] sm:$0xf] %v384_v6 }
 0x1b1   : > { %v407_v9 = vpack.c.b16 %v406_v8, %v405_v7 }
 0x1b3   : > { %465 = vmatmul.bf16.vlgmr.msra.gmra.mxu1 %v407_v9 }
 0x1b6   : > { %v1186_v11 = vld [vmem:[#allocation2 + $0x4] sm:$0xf0] }
 0x1b7   : > { %v1097_v12 = vor.u32 %v1186_v11, %v1096_v10 }
 0x1b9   : > { %936 = vmatmul.bf16.vlgmr.msra.gmra.mxu0 %v1097_v12  ;;  %v1225_v12 = vld [vmem:[%s1492_s6 + $0x2] ss:$0 sm:$0xff] }
 0x230   : > { %v466_v14 = vpop.f32.mrf.mxu1 }
 0x231   : > { %v467_v15 = vadd.f32 %v1221_v13, %v466_v14 }
 0x233   : > { %v472_v16 = vsel %vm471_vm8, %v467_v15, 0.0 }
 0x234   : > { %473 = vadd.xlane.f32.xlu2 %v472_v16 }
 0x238   : > { %v468_v17 = vpop.f32.mrf.mxu1 }
 0x239   : > { %v469_v18 = vadd.f32 %v1221_v13, %v468_v17 }
 0x23b   : > { %v475_v19 = vsel %vm471_vm8, %v469_v18, 0.0 }
 0x23c   : > { %476 = vadd.xlane.f32.xlu2 %v475_v19  ;;  %v1265_v19 = vmov 32.0  }
 0x2a7   : > { %v474_v27 = vpop.xlane.xlu2 %473 }
 0x2a8   : > { %v485_v28 = vmul.f32 %v484_v26, %v474_v27 }
 0x2aa   : > { %v487_v29 = vsub.f32 %v467_v15, %v485_v28 }
 0x2ac   : > { %v489_v30 = vmul.f32 %v487_v29, %v487_v29 }
 0x2ae   : > { %v491_v31 = vsel %vm471_vm8, %v489_v30, 0.0 }
 0x2af   : > { %492 = vadd.xlane.f32.xlu0 %v491_v31  ;;  %v477_v32 = vpop.xlane.xlu2 %476 }
 0x2b0   : > { %v486_v33 = vmul.f32 %v484_v26, %v477_v32 }
 0x2b2   : > { %v488_v34 = vsub.f32 %v469_v18, %v486_v33 }
 0x2b4   : > { %v490_v35 = vmul.f32 %v488_v34, %v488_v34 }
 0x2b6   : > { %v494_v36 = vsel %vm471_vm8, %v490_v35, 0.0 }
 0x2b7   : > { %495 = vadd.xlane.f32.xlu1 %v494_v36  ;;  %v1184_v36 = vld [vmem:[%s1490_s4 + $0x8] sm:$0xff] }
 0x2b8   : > { %686 = vmatpush.bf16.msra.mxu3 %v1184_v36 }
 0x2bc   : > { %687 = vmatpush.bf16.msra.mxu3 %v1183_v39 }
 0x322   : > { %v493_v38 = vpop.xlane.xlu0 %492 }
 0x323   : > { %v497_v40 = vmul.f32 %v493_v38, %v484_v26 }
 0x325   : > { %v499_v42 = vadd.f32 1e-05, %v497_v40 }
 0x327   : > { %1239 = vrsqrt.f32 %v499_v42  ;;  %vm507_vm11 = vweird.f32 %v499_v42 }
 0x32a   : > { %v496_v44 = vpop.xlane.xlu1 %495 }
 0x32b   : > { %v498_v45 = vmul.f32 %v496_v44, %v484_v26 }
 0x32d   : > { %v1240_v46 = vpop.eup %1239  ;;  %v500_v47 = vadd.f32 1e-05, %v498_v45 }
 0x32e   : > { %v502_v48 = vmul.f32 %v1240_v46, %v499_v42  ;;  %vm508_vm10 = vweird.f32 %v1240_v46 }
 0x32f   : > { %1241 = vrsqrt.f32 %v500_v47  ;;  %vm509_vm12 = vmor %vm507_vm11, %vm508_vm10  ;;  %vm517_vm14 = vweird.f32 %v500_v47  ;;  %vm769_vm10 = vcmask 781824  }
 0x330   : > { %v503_v49 = vmul.f32 %v1240_v46, %v502_v48  ;;  %1243 = vrcp.f32 %v1265_v19 }
 0x332   : > { %v504_v50 = vmul.f32 0.5, %v503_v49 }
 0x334   : > { %v505_v51 = vsub.f32 1.5, %v504_v50 }
 0x335   : > { %v1242_v52 = vpop.eup %1241 }
 0x336   : > { %v506_v53 = vmul.f32 %v1240_v46, %v505_v51  ;;  %v512_v54 = vmul.f32 %v1242_v52, %v500_v47  ;;  %vm518_vm13 = vweird.f32 %v1242_v52  ;;  %v1244_v20 = vpop.eup %1243 }
 0x337   : > { %vm519_vm15 = vmor %vm517_vm14, %vm518_vm13  ;;  %v598_v21 = vmul.f32 32.0, %v1244_v20  ;;  %vm602_vm2 = vweird.f32 %v1244_v20 }
 0x338   : > { %v510_v56 = vsel %vm509_vm12, %v1240_v46, %v506_v53  ;;  %v513_v57 = vmul.f32 %v1242_v52, %v512_v54 }
 0x339   : > { %v521_v58 = vmul.f32 %v510_v56, %v487_v29  ;;  %v599_v22 = vsub.f32 1.0, %v598_v21 }
 0x33a   : > { %v514_v60 = vmul.f32 0.5, %v513_v57 }
 0x33b   : > { %v525_v61 = vmul.f32 %v1223_v55, %v521_v58  ;;  %v600_v23 = vmul.f32 %v1244_v20, %v599_v22  ;;  %v1227_v58 = vld [vmem:[%s1492_s6 + $0xa] ss:$0 sm:$0xff] }
 0x33c   : > { %v515_v62 = vsub.f32 1.5, %v514_v60 }
 0x33d   : > { %v529_v63 = vadd.f32 %v1224_v59, %v525_v61  ;;  %v601_v24 = vadd.f32 %v1244_v20, %v600_v23 }
 0x33e   : > { %v516_v0 = vmul.f32 %v1242_v52, %v515_v62 }
 0x33f   : > { %v531_v1 = vmax.f32 %v529_v63, 0.0  ;;  %v603_v25 = vsel %vm602_vm2, %v1244_v20, %v601_v24  ;;  %vm780_vm2 = vcmask 847616  }
 0x340   : > { %v520_v2 = vsel %vm519_vm15, %v1242_v52, %v516_v0  ;;  %v1226_v52 = vld [vmem:[%s1492_s6 + $0x6] ss:$0 sm:$0xff] }
 0x341   : > { %v522_v3 = vmul.f32 %v520_v2, %v488_v34  ;;  %v533_v4 = vpack.c.bf16 %v531_v1, %v531_v1 }
 0x343   : > { %v526_v5 = vmul.f32 %v1223_v55, %v522_v3  ;;  %761 = vst.msk [vmem:[#allocation2 + $0x4] sm:$0xf] %vm760_vm1, %v533_v4  ;;  %v547_v9 = vunpack.c.l.b16 %v533_v4 }
 0x345   : > { %v530_v6 = vadd.f32 %v1224_v59, %v526_v5 }
 0x347   : > { %v532_v7 = vmax.f32 %v530_v6, 0.0 }
 0x349   : > { %v534_v8 = vpack.c.bf16 %v532_v7, %v532_v7 }
 0x34b   : > { %v548_v10 = vunpack.c.l.b16 %v534_v8  ;;  %762 = vst.msk [vmem:[#allocation2 + $0xc] sm:$0xf] %vm760_vm1, %v534_v8 }
 0x34d   : > { %v549_v11 = vpack.c.b16 %v548_v10, %v547_v9  ;;  %v1228_v9 = vld [vmem:[%s1492_s6 + $0x3] ss:$0 sm:$0xff] }
 0x34f   : > { %1084 = vmatmul.msk.bf16.vlgmr.msrb.gmra.mxu2 %vm471_vm8, %v549_v11 }
 0x3d2   : > { %v586_v13 = vpop.f32.mrf.mxu2 }
 0x3d3   : > { %v587_v14 = vadd.f32 %v1225_v12, %v586_v13 }
 0x3d5   : > { %v591_v15 = vsel %vm308_vm0, %v587_v14, 0.0 }
 0x3d6   : > { %592 = vadd.xlane.f32.xlu2 %v591_v15 }
 0x3da   : > { %v588_v16 = vpop.f32.mrf.mxu2 }
 0x3db   : > { %v589_v17 = vadd.f32 %v1225_v12, %v588_v16  ;;  %v1267_v16 = vmov 8.0  }
 0x3dd   : > { %v594_v18 = vsel %vm308_vm0, %v589_v17, 0.0 }
 0x3de   : > { %595 = vadd.xlane.f32.xlu0 %v594_v18 }
 0x449   : > { %v593_v26 = vpop.xlane.xlu2 %592 }
 0x44a   : > { %v604_v27 = vmul.f32 %v603_v25, %v593_v26 }
 0x44c   : > { %v606_v28 = vsub.f32 %v587_v14, %v604_v27 }
 0x44e   : > { %v608_v29 = vmul.f32 %v606_v28, %v606_v28 }
 0x450   : > { %v610_v30 = vsel %vm308_vm0, %v608_v29, 0.0 }
 0x451   : > { %v596_v31 = vpop.xlane.xlu0 %595  ;;  %611 = vadd.xlane.f32.xlu1 %v610_v30 }
 0x452   : > { %v605_v32 = vmul.f32 %v603_v25, %v596_v31 }
 0x454   : > { %v607_v33 = vsub.f32 %v589_v17, %v605_v32 }
 0x456   : > { %v609_v34 = vmul.f32 %v607_v33, %v607_v33 }
 0x458   : > { %v613_v35 = vsel %vm308_vm0, %v609_v34, 0.0 }
 0x459   : > { %614 = vadd.xlane.f32.xlu2 %v613_v35 }
 0x4c4   : > { %v612_v37 = vpop.xlane.xlu1 %611 }
 0x4c5   : > { %v616_v38 = vmul.f32 %v612_v37, %v603_v25 }
 0x4c7   : > { %v618_v40 = vadd.f32 1e-05, %v616_v38 }
 0x4c9   : > { %1245 = vrsqrt.f32 %v618_v40  ;;  %vm626_vm4 = vweird.f32 %v618_v40 }
 0x4cc   : > { %v615_v41 = vpop.xlane.xlu2 %614 }
 0x4cd   : > { %v617_v42 = vmul.f32 %v615_v41, %v603_v25 }
 0x4cf   : > { %v1246_v43 = vpop.eup %1245  ;;  %v619_v44 = vadd.f32 1e-05, %v617_v42 }
 0x4d0   : > { %v621_v45 = vmul.f32 %v1246_v43, %v618_v40  ;;  %vm627_vm3 = vweird.f32 %v1246_v43  ;;  %v1202_v40 = vld [vmem:[%s1491_s5 + $0x78] sm:$0xff] }
 0x4d1   : > { %1247 = vrsqrt.f32 %v619_v44  ;;  %vm628_vm5 = vmor %vm626_vm4, %vm627_vm3  ;;  %vm636_vm7 = vweird.f32 %v619_v44  ;;  %942 = vmatpush.bf16.msrb.mxu3 %v1202_v40  ;;  %vm783_vm3 = vcmask 1044288  }
 0x4d2   : > { %v622_v46 = vmul.f32 %v1246_v43, %v621_v45  ;;  %1249 = vrcp.f32 %v1267_v16 }
 0x4d4   : > { %v623_v47 = vmul.f32 0.5, %v622_v46 }
 0x4d6   : > { %v624_v48 = vsub.f32 1.5, %v623_v47 }
 0x4d7   : > { %v1248_v49 = vpop.eup %1247 }
 0x4d8   : > { %v625_v50 = vmul.f32 %v1246_v43, %v624_v48  ;;  %v631_v51 = vmul.f32 %v1248_v49, %v619_v44  ;;  %vm637_vm6 = vweird.f32 %v1248_v49  ;;  %v1250_v17 = vpop.eup %1249 }
 0x4d9   : > { %vm638_vm8 = vmor %vm636_vm7, %vm637_vm6  ;;  %v702_v18 = vmul.f32 8.0, %v1250_v17 }
 0x4da   : > { %v629_v53 = vsel %vm628_vm5, %v1246_v43, %v625_v50  ;;  %v632_v54 = vmul.f32 %v1248_v49, %v631_v51  ;;  %v1229_v50 = vld [vmem:[%s1492_s6 + $0x7] ss:$0 sm:$0xff] }
 0x4db   : > { %v640_v55 = vmul.f32 %v629_v53, %v606_v28  ;;  %v703_v19 = vsub.f32 1.0, %v702_v18  ;;  %v1222_v18 = vld [vmem:[%s1492_s6 + $0xc] ss:$0 sm:$0xff] }
 0x4dc   : > { %v633_v56 = vmul.f32 0.5, %v632_v54  ;;  %v1230_v54 = vld [vmem:[%s1492_s6 + $0xb] ss:$0 sm:$0xff] }
 0x4dd   : > { %v644_v57 = vmul.f32 %v1226_v52, %v640_v55  ;;  %v704_v20 = vmul.f32 %v1250_v17, %v703_v19 }
 0x4de   : > { %v634_v59 = vsub.f32 1.5, %v633_v56 }
 0x4df   : > { %v648_v61 = vadd.f32 %v1227_v58, %v644_v57  ;;  %v705_v21 = vadd.f32 %v1250_v17, %v704_v20 }
 0x4e0   : > { %v635_v60 = vmul.f32 %v1248_v49, %v634_v59 }
 0x4e1   : > { %v650_v1 = vmax.f32 %v648_v61, 0.0 }
 0x4e2   : > { %v639_v62 = vsel %vm638_vm8, %v1248_v49, %v635_v60 }
 0x4e3   : > { %v641_v63 = vmul.f32 %v639_v62, %v607_v33  ;;  %v652_v4 = vpack.c.bf16 %v650_v1, %v650_v1 }
 0x4e5   : > { %v645_v0 = vmul.f32 %v1226_v52, %v641_v63  ;;  %v662_v6 = vunpack.c.l.b16 %v652_v4 }
 0x4e7   : > { %v649_v2 = vadd.f32 %v1227_v58, %v645_v0 }
 0x4e9   : > { %v651_v3 = vmax.f32 %v649_v2, 0.0 }
 0x4eb   : > { %v653_v5 = vpack.c.bf16 %v651_v3, %v651_v3 }
 0x4ed   : > { %v663_v7 = vunpack.c.l.b16 %v653_v5 }
 0x4ef   : > { %v664_v8 = vpack.c.b16 %v663_v7, %v662_v6  ;;  %v1199_v6 = vld [vmem:[%s1491_s5 + $0x60] sm:$0xff]  ;;  %v1198_v7 = vld [vmem:[%s1491_s5 + $0x58] sm:$0xff] }
 0x4f1   : > { %1093 = vmatmul.msk.bf16.vlgmr.msra.gmra.mxu3 %vm308_vm0, %v664_v8  ;;  %vm706_vm0 = vweird.f32 %v1250_v17  ;;  %v1197_v8 = vld [vmem:[%s1491_s5 + $0x50] sm:$0xff] }
 0x4f2   : > { %v707_v22 = vsel %vm706_vm0, %v1250_v17, %v705_v21  ;;  %v937_v17 = vpop.f32.mrf.mxu0 }
 0x4f3   : > { %v938_v19 = vadd.f32 %v1222_v18, %v937_v17 }
 0x574   : > { %v689_v10 = vpop.f32.mrf.mxu3 }
 0x575   : > { %v690_v11 = vadd.f32 %v1228_v9, %v689_v10  ;;  %v1195_v10 = vld [vmem:[%s1491_s5 + $0x40] sm:$0xff] }
 0x577   : > { %v695_v12 = vsel %vm694_vm9, %v690_v11, 0.0 }
 0x578   : > { %696 = vadd.xlane.f32.xlu0 %v695_v12  ;;  %v1269_v12 = vmov 0  }
 0x57c   : > { %v691_v13 = vpop.f32.mrf.mxu3 }
 0x57d   : > { %v692_v14 = vadd.f32 %v1228_v9, %v691_v13  ;;  %v1196_v9 = vld [vmem:[%s1491_s5 + $0x48] sm:$0xff] }
 0x57f   : > { %v698_v15 = vsel %vm694_vm9, %v692_v14, 0.0 }
 0x580   : > { %699 = vadd.xlane.f32.xlu1 %v698_v15 }
 0x599   : > { %763 = vrot.lane.b32.xlu1 %v652_v4, %s1266_s13  ;;  %v1201_v4 = vld [vmem:[%s1491_s5 + $0x70] sm:$0xff] }
 0x59a   : > { %943 = vmatpush.bf16.msrb.mxu3 %v1201_v4 }
 0x5eb   : > { %v697_v23 = vpop.xlane.xlu0 %696 }
 0x5ec   : > { %v708_v24 = vmul.f32 %v707_v22, %v697_v23 }
 0x5ee   : > { %v710_v25 = vsub.f32 %v690_v11, %v708_v24 }
 0x5f0   : > { %v712_v26 = vmul.f32 %v710_v25, %v710_v25 }
 0x5f2   : > { %v714_v27 = vsel %vm694_vm9, %v712_v26, 0.0 }
 0x5f3   : > { %v700_v28 = vpop.xlane.xlu1 %699  ;;  %715 = vadd.xlane.f32.xlu2 %v714_v27 }
 0x5f4   : > { %v709_v29 = vmul.f32 %v707_v22, %v700_v28 }
 0x5f6   : > { %v711_v30 = vsub.f32 %v692_v14, %v709_v29 }
 0x5f8   : > { %v713_v31 = vmul.f32 %v711_v30, %v711_v30 }
 0x5fa   : > { %v717_v32 = vsel %vm694_vm9, %v713_v31, 0.0 }
 0x5fb   : > { %718 = vadd.xlane.f32.xlu0 %v717_v32 }
 0x60b   : > { %v764_v33 = vpop.permute.xlu1 %763  ;;  %765 = vrot.lane.b32.xlu2 %v653_v5, %s1266_s13  ;;  %v1200_v5 = vld [vmem:[%s1491_s5 + $0x68] sm:$0xff] }
 0x60c   : > { %770 = vst.msk [vmem:[#allocation2 + $0x4] sm:$0xf] %vm769_vm10, %v764_v33  ;;  %944 = vmatpush.bf16.msrb.mxu3 %v1200_v5 }
 0x610   : > { %945 = vmatpush.bf16.msrb.mxu3 %v1199_v6 }
 0x614   : > { %946 = vmatpush.bf16.msrb.mxu3 %v1198_v7 }
 0x618   : > { %947 = vmatpush.bf16.msrb.mxu3 %v1197_v8 }
 0x61c   : > { %948 = vmatpush.bf16.msrb.mxu3 %v1196_v9 }
 0x620   : > { %949 = vmatpush.bf16.msrb.mxu3 %v1195_v10 }
 0x666   : > { %v716_v34 = vpop.xlane.xlu2 %715 }
 0x667   : > { %v720_v35 = vmul.f32 %v716_v34, %v707_v22 }
 0x669   : > { %v722_v36 = vadd.f32 1e-05, %v720_v35 }
 0x66b   : > { %1251 = vrsqrt.f32 %v722_v36  ;;  %vm730_vm12 = vweird.f32 %v722_v36 }
 0x66e   : > { %v766_v37 = vpop.permute.xlu2 %765  ;;  %v719_v38 = vpop.xlane.xlu0 %718 }
 0x66f   : > { %771 = vst.msk [vmem:[#allocation2 + $0xc] sm:$0xf] %vm769_vm10, %v766_v37  ;;  %v721_v39 = vmul.f32 %v719_v38, %v707_v22  ;;  %v939_v22 = vpop.f32.mrf.mxu0 }
 0x670   : > { %v940_v23 = vadd.f32 %v1222_v18, %v939_v22 }
 0x671   : > { %v1252_v41 = vpop.eup %1251  ;;  %v723_v42 = vadd.f32 1e-05, %v721_v39 }
 0x672   : > { %v725_v43 = vmul.f32 %v1252_v41, %v722_v36  ;;  %vm731_vm11 = vweird.f32 %v1252_v41 }
 0x673   : > { %1253 = vrsqrt.f32 %v723_v42  ;;  %vm732_vm13 = vmor %vm730_vm12, %vm731_vm11  ;;  %vm740_vm15 = vweird.f32 %v723_v42 }
 0x674   : > { %v726_v44 = vmul.f32 %v1252_v41, %v725_v43 }
 0x676   : > { %v727_v45 = vmul.f32 0.5, %v726_v44 }
 0x678   : > { %v728_v46 = vsub.f32 1.5, %v727_v45 }
 0x679   : > { %v1254_v47 = vpop.eup %1253 }
 0x67a   : > { %v729_v48 = vmul.f32 %v1252_v41, %v728_v46  ;;  %v735_v49 = vmul.f32 %v1254_v47, %v723_v42  ;;  %vm741_vm14 = vweird.f32 %v1254_v47 }
 0x67b   : > { %vm742_vm1 = vmor %vm740_vm15, %vm741_vm14 }
 0x67c   : > { %v733_v51 = vsel %vm732_vm13, %v1252_v41, %v729_v48  ;;  %v736_v52 = vmul.f32 %v1254_v47, %v735_v49 }
 0x67d   : > { %v744_v53 = vmul.f32 %v733_v51, %v710_v25 }
 0x67e   : > { %v737_v55 = vmul.f32 0.5, %v736_v52 }
 0x67f   : > { %v748_v56 = vmul.f32 %v1229_v50, %v744_v53 }
 0x680   : > { %v738_v57 = vsub.f32 1.5, %v737_v55 }
 0x681   : > { %v752_v58 = vadd.f32 %v1230_v54, %v748_v56 }
 0x682   : > { %v739_v59 = vmul.f32 %v1254_v47, %v738_v57 }
 0x683   : > { %v754_v60 = vmax.f32 %v752_v58, 0.0 }
 0x684   : > { %v743_v61 = vsel %vm742_vm1, %v1254_v47, %v739_v59 }
 0x685   : > { %v756_v62 = vpack.c.bf16 %v754_v60, %v754_v60  ;;  %v745_v63 = vmul.f32 %v743_v61, %v711_v30 }
 0x687   : > { %774 = vrot.lane.b32.xlu0 %v756_v62, %s1268_s20  ;;  %v749_v0 = vmul.f32 %v1229_v50, %v745_v63 }
 0x689   : > { %v753_v1 = vadd.f32 %v1230_v54, %v749_v0 }
 0x68b   : > { %v755_v2 = vmax.f32 %v753_v1, 0.0 }
 0x68d   : > { %v757_v3 = vpack.c.bf16 %v755_v2, %v755_v2 }
 0x68f   : > { %776 = vrot.lane.b32.xlu2 %v757_v3, %s1268_s20 }
 0x6e9   : > { %v777_v11 = vpop.permute.xlu2 %776 }
 0x6ea   : > { %782 = vst.msk [vmem:[#allocation2 + $0xc] sm:$0xf] %vm780_vm2, %v777_v11 }
 0x6eb   : > { %785 = vst.msk [vmem:[#allocation2 + $0xc] sm:$0xf] %vm783_vm3, %v1269_v12 }
 0x6f2   : > { %v1098_v14 = vld [vmem:[#allocation2 + $0x8] sm:$0xf0] }
 0x6f9   : > { %v775_v13 = vpop.permute.xlu0 %774 }
 0x6fa   : > { %781 = vst.msk [vmem:[#allocation2 + $0x4] sm:$0xf] %vm780_vm2, %v775_v13 }
 0x6fb   : > { %784 = vst.msk [vmem:[#allocation2 + $0x4] sm:$0xf] %vm783_vm3, %v1269_v12 }
 0x702   : > { %v1185_v15 = vld [vmem:[#allocation2 + $0x4] sm:$0xf] }
 0x703   : > { %v1101_v16 = vor.u32 %v1185_v15, %v1098_v14 }
 0x705   : > { %950 = vmatmul.bf16.vlgmr.msrb.gmra.mxu3 %v1101_v16 }
 0x788   : > { %v951_v20 = vpop.f32.mrf.mxu3 }
 0x789   : > { %v952_v21 = vadd.f32 %v951_v20, %v938_v19 }
 0x78b   : > { %956 = vst [vmem:[%s280_s19] sm:$0xff] %v952_v21 }
 0x790   : > { %v953_v24 = vpop.f32.mrf.mxu3 }
 0x791   : > { %v954_v25 = vadd.f32 %v953_v24, %v940_v23 }
 0x793   : > { %957 = vst [vmem:[%s280_s19 + $0x8] sm:$0xff] %v954_v25 }
 0x794 PF: > { %s17_s24 = sadd.s32 1, %s1261_s24  }
 0x795   : > { %p14_p4 = scmp.ge.s32.totalorder %s17_s24, 4  }
 0x797   :  { %16 = sbr.rel (!%p14_p4) target bundleno = 1 (0x1), region = 78 }

</bundles_post_ra>
